<compile_context>
chip_gen: v7x
topology: tpu7x:2x2x1
jax: 0.10.0
libtpu: 0.0.40
codegen_flags: <defaults>
</compile_context>

<pallas_src>
import functools
import math

import jax
import jax.numpy as jnp
from jax import lax
from jax.experimental import pallas as pl
from jax.experimental.pallas import tpu as pltpu  # noqa: F401  (used when scaling up)


# ---------------------------------------------------------------------------
# Fused kernel: entire Attention.forward for all batches at once.
#   x_ref    : (B*S, D)
#   pen_ref  : (B*S, B*S)  additive score penalty (0 keep / -1e6 pad / -2e6 cross-batch)
#   wqkv_ref : (D, 3*H*Dh) [Wq | Wk | Wv] concatenated along the out dim
#   bqkv_ref : (1, 3*H*Dh)
#   wo_ref   : (H*Dh, D)
#   bo_ref   : (1, D)
#   o_ref    : (B*S, D)
# ---------------------------------------------------------------------------
def _fused_attention_kernel(x_ref, pen_ref, wqkv_ref, bqkv_ref, wo_ref, bo_ref,
                            o_ref, *, num_head, head_dim):
    inner = num_head * head_dim
    scale = 1.0 / math.sqrt(head_dim)
    contract_last = (((1,), (1,)), ((), ()))   # contract last dim of both operands

    # Fused QKV projection: (B*S, D) @ (D, 3*H*Dh) + bias.
    x = x_ref[...]
    qkv = jnp.dot(x, wqkv_ref[...], preferred_element_type=jnp.float32) + bqkv_ref[...]
    penalty = pen_ref[...]                     # (B*S, B*S), loaded once

    rows, dim = o_ref.shape
    o_acc = jnp.zeros((rows, dim), jnp.float32)

    # Small static loop over heads only (H=2 here); each iteration batches the
    # score matmul over all batches at once (block-diagonal penalty handles
    # cross-batch keys), so there are H -- not B*H -- tiny MXU push chains.
    # TODO(synk): if H grows past ~16, move heads onto a grid axis instead of
    #             static unrolling (vreg pressure / program size).
    for h in range(num_head):
        c0 = h * head_dim
        q = qkv[:, c0:c0 + head_dim]                              # (B*S, Dh)
        k = qkv[:, inner + c0:inner + c0 + head_dim]              # (B*S, Dh)
        v = qkv[:, 2 * inner + c0:2 * inner + c0 + head_dim]      # (B*S, Dh)

        # scores = Q K^T / sqrt(Dh) + penalty      (no explicit transpose)
        scores = lax.dot_general(q, k, contract_last,
                                 preferred_element_type=jnp.float32) * scale
        scores = scores + penalty
        # numerically stable softmax over keys (exact divide; EUP not a bottleneck)
        scores = scores - jnp.max(scores, axis=-1, keepdims=True)
        p = jnp.exp(scores)
        p = p / jnp.sum(p, axis=-1, keepdims=True)
        # TODO(synk): attention dropout (drop_attn) is identity at inference.

        attn = jnp.dot(p, v, preferred_element_type=jnp.float32)         # (B*S, Dh)
        # Accumulate the output projection per head in registers; wo row slices
        # at multiples of head_dim=16 are sublane-aligned.
        o_acc = o_acc + jnp.dot(attn, wo_ref[c0:c0 + head_dim, :],
                                preferred_element_type=jnp.float32)

    # Single lane-dense store of the final result.
    o_ref[...] = (o_acc + bo_ref[...]).astype(o_ref.dtype)


# ---------------------------------------------------------------------------
# Wrapper: single jitted pallas_call, no grid (everything fits in VMEM at
# these sizes), pre-fused QKV weights come straight from params.
# ---------------------------------------------------------------------------
@functools.partial(jax.jit, static_argnames=("num_head", "head_dim"))
def attention_forward(X, mask, params, num_head, head_dim):
    B, S, D = X.shape
    x2 = X.reshape(B * S, D).astype(jnp.float32)

    # Additive score penalty, built once (tiny (B*S, B*S)) and fused under jit:
    #   same batch, valid key   ->  0
    #   same batch, padded key  -> -1e6   (matches the reference's 1e6 * (1-mask))
    #   cross batch             -> -2e6   (always underflows relative to in-batch)
    batch_ids = jnp.repeat(jnp.arange(B), S)                       # (B*S,)
    same_batch = batch_ids[:, None] == batch_ids[None, :]          # (B*S, B*S)
    key_pad_pen = -1.0e6 * (1.0 - mask.reshape(B * S).astype(jnp.float32))
    penalty = jnp.where(same_batch, key_pad_pen[None, :], jnp.float32(-2.0e6))

    kernel = functools.partial(_fused_attention_kernel,
                               num_head=num_head, head_dim=head_dim)

    out = pl.pallas_call(
        kernel,
        out_shape=jax.ShapeDtypeStruct((B * S, D), jnp.float32),
    )(x2, penalty, params["wqkv"], params["bqkv"], params["wo"], params["bo"])

    return out.reshape(B, S, D)


# ---------------------------------------------------------------------------
# Pure-JAX reference (mirrors the PyTorch module) for a correctness gate.
# ---------------------------------------------------------------------------
def attention_reference(X, mask, params, num_head, head_dim):
    B, S, D = X.shape

    def split_heads(y):
        return y.reshape(B, S, num_head, head_dim).transpose(0, 2, 1, 3)

    Q = split_heads(X @ params["wq"] + params["bq"])
    K = split_heads(X @ params["wk"] + params["bk"])
    V = split_heads(X @ params["wv"] + params["bv"])

    scores = jnp.einsum("bhqd,bhkd->bhqk", Q, K) / math.sqrt(head_dim)
    scores = scores - 1e6 * (1.0 - mask[:, None, None, :])
    attn = jax.nn.softmax(scores, axis=-1)
    out = jnp.einsum("bhqk,bhkd->bhqd", attn, V)
    out = out.transpose(0, 2, 1, 3).reshape(B, S, num_head * head_dim)
    return out @ params["wo"] + params["bo"]


# ---------------------------------------------------------------------------
# Deterministic parameter init (PyTorch nn.Linear default U(-1/sqrt(fan_in), +)),
# weights stored pre-transposed to (in, out).  The fused QKV weight/bias are
# built HERE (once), not per forward call.
# ---------------------------------------------------------------------------
def init_params(key, dim, num_head, head_dim):
    inner = num_head * head_dim
    keys = jax.random.split(key, 8)

    def lin(kw, kb, fan_in, fan_out):
        bound = 1.0 / math.sqrt(fan_in)
        w = jax.random.uniform(kw, (fan_in, fan_out), jnp.float32, -bound, bound)
        b = jax.random.uniform(kb, (1, fan_out), jnp.float32, -bound, bound)
        return w, b

    wq, bq = lin(keys[0], keys[1], dim, inner)
    wk, bk = lin(keys[2], keys[3], dim, inner)
    wv, bv = lin(keys[4], keys[5], dim, inner)
    wo, bo = lin(keys[6], keys[7], inner, dim)

    wqkv = jnp.concatenate([wq, wk, wv], axis=1)   # (dim, 3*inner), fused once
    bqkv = jnp.concatenate([bq, bk, bv], axis=1)   # (1, 3*inner)

    return dict(wq=wq, bq=bq, wk=wk, bk=bk, wv=wv, bv=bv, wo=wo, bo=bo,
                wqkv=wqkv, bqkv=bqkv)


if __name__ == "__main__":
    # config: transformer_dim=32, num_head=2, head_dim=16, attn_type='softmax'
    B, S, DIM, NUM_HEAD, HEAD_DIM = 2, 8, 32, 2, 16

    key = jax.random.PRNGKey(0)
    k_params, k_x = jax.random.split(key)

    params = init_params(k_params, DIM, NUM_HEAD, HEAD_DIM)
    X = jax.random.normal(k_x, (B, S, DIM), jnp.float32)
    # mask: batch 0 fully valid, batch 1 has last 2 positions padded
    lengths = jnp.array([S, S - 2])
    mask = (jnp.arange(S)[None, :] < lengths[:, None]).astype(jnp.float32)  # (B, S)

    out = attention_forward(X, mask, params, NUM_HEAD, HEAD_DIM)
    jax.block_until_ready(out)

    assert out.shape == (B, S, DIM) and out.dtype == jnp.float32

    ref = attention_reference(X, mask, params, NUM_HEAD, HEAD_DIM)
    assert jnp.allclose(out, ref, rtol=1e-4, atol=1e-4), "mismatch vs reference"

    print("KERNEL_OK")
</pallas_src>

<mosaic_0001>
module attributes {stable_mosaic.version = 11 : i64} {
  func.func @_fused_attention_kernel(%arg0: memref<16x32xf32, #tpu.memory_space<vmem>>, %arg1: memref<16x16xf32, #tpu.memory_space<vmem>>, %arg2: memref<32x96xf32, #tpu.memory_space<vmem>>, %arg3: memref<1x96xf32, #tpu.memory_space<vmem>>, %arg4: memref<32x32xf32, #tpu.memory_space<vmem>>, %arg5: memref<1x32xf32, #tpu.memory_space<vmem>>, %arg6: memref<16x32xf32, #tpu.memory_space<vmem>>) attributes {dimension_semantics = [], scalar_prefetch = 0 : i64, scratch_operands = 0 : i64, tpu.core_type = #tpu.core_type<tc>} {
    %c0 = arith.constant 0 : index
    %c0_0 = arith.constant 0 : index
    %0 = vector.load %arg0[%c0, %c0_0] : memref<16x32xf32, #tpu.memory_space<vmem>>, vector<16x32xf32>
    %c0_1 = arith.constant 0 : index
    %c0_2 = arith.constant 0 : index
    %1 = vector.load %arg2[%c0_1, %c0_2] : memref<32x96xf32, #tpu.memory_space<vmem>>, vector<32x96xf32>
    %cst = arith.constant dense<0.000000e+00> : vector<16x96xf32>
    %2 = tpu.matmul %0, %1, %cst {dimension_numbers = #tpu.dot_dimension_numbers<[1], [0], [0], [1], [0, 0, 1, 1], [], []>} : vector<16x32xf32>, vector<32x96xf32>, vector<16x96xf32> -> vector<16x96xf32>
    %c0_3 = arith.constant 0 : index
    %c0_4 = arith.constant 0 : index
    %3 = vector.load %arg3[%c0_3, %c0_4] : memref<1x96xf32, #tpu.memory_space<vmem>>, vector<1x96xf32>
    %4 = vector.broadcast %3 : vector<1x96xf32> to vector<16x96xf32>
    %5 = arith.addf %2, %4 : vector<16x96xf32>
    %c0_5 = arith.constant 0 : index
    %c0_6 = arith.constant 0 : index
    %6 = vector.load %arg1[%c0_5, %c0_6] : memref<16x16xf32, #tpu.memory_space<vmem>>, vector<16x16xf32>
    %cst_7 = arith.constant 0.000000e+00 : f32
    %7 = vector.broadcast %cst_7 : f32 to vector<16x32xf32>
    %8 = vector.extract_strided_slice %5 {offsets = [0, 0], sizes = [16, 16], strides = [1, 1]} : vector<16x96xf32> to vector<16x16xf32>
    %9 = vector.extract_strided_slice %5 {offsets = [0, 32], sizes = [16, 16], strides = [1, 1]} : vector<16x96xf32> to vector<16x16xf32>
    %10 = vector.extract_strided_slice %5 {offsets = [0, 64], sizes = [16, 16], strides = [1, 1]} : vector<16x96xf32> to vector<16x16xf32>
    %cst_8 = arith.constant dense<0.000000e+00> : vector<16x16xf32>
    %11 = tpu.matmul %8, %9, %cst_8 {dimension_numbers = #tpu.dot_dimension_numbers<[1], [1], [0], [0], [0, 0, 1, 0], [], []>} : vector<16x16xf32>, vector<16x16xf32>, vector<16x16xf32> -> vector<16x16xf32>
    %cst_9 = arith.constant 2.500000e-01 : f32
    %12 = vector.broadcast %cst_9 : f32 to vector<16x16xf32>
    %13 = arith.mulf %11, %12 : vector<16x16xf32>
    %14 = arith.addf %13, %6 : vector<16x16xf32>
    %cst_10 = arith.constant dense<0xFF800000> : vector<16xf32>
    %15 = vector.multi_reduction <maximumf>, %14, %cst_10 [1] : vector<16x16xf32> to vector<16xf32>
    %16 = vector.shape_cast %15 : vector<16xf32> to vector<16x1xf32>
    %17 = vector.broadcast %16 : vector<16x1xf32> to vector<16x16xf32>
    %18 = arith.subf %14, %17 : vector<16x16xf32>
    %19 = math.exp %18 : vector<16x16xf32>
    %cst_11 = arith.constant dense<0.000000e+00> : vector<16xf32>
    %20 = vector.multi_reduction <add>, %19, %cst_11 [1] : vector<16x16xf32> to vector<16xf32>
    %21 = vector.shape_cast %20 : vector<16xf32> to vector<16x1xf32>
    %22 = vector.broadcast %21 : vector<16x1xf32> to vector<16x16xf32>
    %23 = arith.divf %19, %22 : vector<16x16xf32>
    %cst_12 = arith.constant dense<0.000000e+00> : vector<16x16xf32>
    %24 = tpu.matmul %23, %10, %cst_12 {dimension_numbers = #tpu.dot_dimension_numbers<[1], [0], [0], [1], [0, 0, 1, 1], [], []>} : vector<16x16xf32>, vector<16x16xf32>, vector<16x16xf32> -> vector<16x16xf32>
    %c0_13 = arith.constant 0 : index
    %c0_14 = arith.constant 0 : index
    %25 = vector.load %arg4[%c0_13, %c0_14] : memref<32x32xf32, #tpu.memory_space<vmem>>, vector<16x32xf32>
    %cst_15 = arith.constant dense<0.000000e+00> : vector<16x32xf32>
    %26 = tpu.matmul %24, %25, %cst_15 {dimension_numbers = #tpu.dot_dimension_numbers<[1], [0], [0], [1], [0, 0, 1, 1], [], []>} : vector<16x16xf32>, vector<16x32xf32>, vector<16x32xf32> -> vector<16x32xf32>
    %27 = arith.addf %7, %26 : vector<16x32xf32>
    %28 = vector.extract_strided_slice %5 {offsets = [0, 16], sizes = [16, 16], strides = [1, 1]} : vector<16x96xf32> to vector<16x16xf32>
    %29 = vector.extract_strided_slice %5 {offsets = [0, 48], sizes = [16, 16], strides = [1, 1]} : vector<16x96xf32> to vector<16x16xf32>
    %30 = vector.extract_strided_slice %5 {offsets = [0, 80], sizes = [16, 16], strides = [1, 1]} : vector<16x96xf32> to vector<16x16xf32>
    %cst_16 = arith.constant dense<0.000000e+00> : vector<16x16xf32>
    %31 = tpu.matmul %28, %29, %cst_16 {dimension_numbers = #tpu.dot_dimension_numbers<[1], [1], [0], [0], [0, 0, 1, 0], [], []>} : vector<16x16xf32>, vector<16x16xf32>, vector<16x16xf32> -> vector<16x16xf32>
    %cst_17 = arith.constant 2.500000e-01 : f32
    %32 = vector.broadcast %cst_17 : f32 to vector<16x16xf32>
    %33 = arith.mulf %31, %32 : vector<16x16xf32>
    %34 = arith.addf %33, %6 : vector<16x16xf32>
    %cst_18 = arith.constant dense<0xFF800000> : vector<16xf32>
    %35 = vector.multi_reduction <maximumf>, %34, %cst_18 [1] : vector<16x16xf32> to vector<16xf32>
    %36 = vector.shape_cast %35 : vector<16xf32> to vector<16x1xf32>
    %37 = vector.broadcast %36 : vector<16x1xf32> to vector<16x16xf32>
    %38 = arith.subf %34, %37 : vector<16x16xf32>
    %39 = math.exp %38 : vector<16x16xf32>
    %cst_19 = arith.constant dense<0.000000e+00> : vector<16xf32>
    %40 = vector.multi_reduction <add>, %39, %cst_19 [1] : vector<16x16xf32> to vector<16xf32>
    %41 = vector.shape_cast %40 : vector<16xf32> to vector<16x1xf32>
    %42 = vector.broadcast %41 : vector<16x1xf32> to vector<16x16xf32>
    %43 = arith.divf %39, %42 : vector<16x16xf32>
    %cst_20 = arith.constant dense<0.000000e+00> : vector<16x16xf32>
    %44 = tpu.matmul %43, %30, %cst_20 {dimension_numbers = #tpu.dot_dimension_numbers<[1], [0], [0], [1], [0, 0, 1, 1], [], []>} : vector<16x16xf32>, vector<16x16xf32>, vector<16x16xf32> -> vector<16x16xf32>
    %c16 = arith.constant 16 : index
    %c0_21 = arith.constant 0 : index
    %45 = vector.load %arg4[%c16, %c0_21] : memref<32x32xf32, #tpu.memory_space<vmem>>, vector<16x32xf32>
    %cst_22 = arith.constant dense<0.000000e+00> : vector<16x32xf32>
    %46 = tpu.matmul %44, %45, %cst_22 {dimension_numbers = #tpu.dot_dimension_numbers<[1], [0], [0], [1], [0, 0, 1, 1], [], []>} : vector<16x16xf32>, vector<16x32xf32>, vector<16x32xf32> -> vector<16x32xf32>
    %47 = arith.addf %27, %46 : vector<16x32xf32>
    %c0_23 = arith.constant 0 : index
    %c0_24 = arith.constant 0 : index
    %48 = vector.load %arg5[%c0_23, %c0_24] : memref<1x32xf32, #tpu.memory_space<vmem>>, vector<1x32xf32>
    %49 = vector.broadcast %48 : vector<1x32xf32> to vector<16x32xf32>
    %50 = arith.addf %47, %49 : vector<16x32xf32>
    %c0_25 = arith.constant 0 : index
    %c0_26 = arith.constant 0 : index
    %51 = vector.load %arg6[%c0_25, %c0_26] : memref<16x32xf32, #tpu.memory_space<vmem>>, vector<16x32xf32>
    tpu.vector_store %arg6[%c0_25, %c0_26], %50 {strides = array<i32>} : memref<16x32xf32, #tpu.memory_space<vmem>>, vector<16x32xf32>,
    return
  }
}

</mosaic_0001>

<bundles_post_ra>
// kernel: eq.8
= control target key start
LH: loop header
LB: loop body
LE: loop exit
PB: predicated region body
PF: predicated region fallthrough
CT: control target
= control target key end

     0   :  { %vm7_vm0 = vcmask 64512   ;;  %vm13_vm1 = vcmask 130112   ;;  %s39_s0 = inlined_call_operand.vmem [shape: s32[2,8], index: 0, kind: input, shape index: {}]   ;;  %s40_s1 = inlined_call_operand.vmem [shape: s32[16], index: 1, kind: output, shape index: {}]  }
   0x1   :  { %v4_v0 = vld [vmem:[%s39_s0] sm:$0x3]  ;;  %s22_s0 = smov 8  }
   0x2   :  { %5 = vst [vmem:[#allocation1] sm:$0x3] %v4_v0 }
   0x9   :  { %v10_v1 = vld [vmem:[#allocation1 + $0x1] sm:$0x1]   ;;  %v6_v2 = vld [vmem:[#allocation1] sm:$0x1]  }
   0xa   :  { %11 = vrot.lane.b32.xlu0 %v10_v1, %s22_s0  ;;  %8 = vst.msk [vmem:[#allocation0] sm:$0x1] %vm7_vm0, %v6_v2  }
  0x7c   :  { %v12_v3 = vpop.permute.xlu0 %11  }
  0x7d   :  { %14 = vst.msk [vmem:[#allocation0] sm:$0x1] %vm13_vm1, %v12_v3  }
  0x84   :  { %v18_v4 = vld [vmem:[#allocation0] sm:$0x1] }
  0x85   :  { %20 = vst [vmem:[%s40_s1] sm:$0x1] %v18_v4 }

// kernel: attention_forward.1
= control target key start
LH: loop header
LB: loop body
LE: loop exit
PB: predicated region body
PF: predicated region fallthrough
CT: control target
= control target key end

     0   :  { %11 = vsyncpa [#allocation3], 0  ;;  %s1122_s0 = inlined_call_operand.vmem [shape: f32[16,32], index: 0, kind: input, shape index: {}]   ;;  %s1123_s1 = inlined_call_operand.vmem [shape: f32[16,16], index: 1, kind: input, shape index: {}]   ;;  %s1124_s2 = inlined_call_operand.vmem [shape: f32[32,96], index: 2, kind: input, shape index: {}]   ;;  %s1125_s3 = inlined_call_operand.vmem [shape: f32[1,96], index: 3, kind: input, shape index: {}]   ;;  %s1126_s4 = inlined_call_operand.hbm [shape: f32[32,32], index: 4, kind: input, shape index: {}]   ;;  %s1127_s5 = inlined_call_operand.vmem [shape: f32[1,32], index: 5, kind: input, shape index: {}]   ;;  %s1128_s6 = inlined_call_operand.hbm [shape: f32[16,32], index: 6, kind: output, shape index: {}]  }
   0x1   :  { %12 = vsyncpa [#allocation4], 0  ;;  %s970_s21 = smov [#allocation2]   ;;  %s922_s25 = scalar_lea.hbm %s1126_s4, 512 }
   0x2   :  { %s26_s22 = sshll.u32 %s970_s21, 4  ;;  %p923_p0 = scmp.ne.s32.totalorder %s1126_s4, %s922_s25  ;;  %s27_s22 = int_to_ptr.vmem [resolvable:$true] %s26_s22 }
   0x3   :  { %p926_p1 = scmp.lt.u32.totalorder %s922_s25, %s1126_s4 }
   0x5   :  { %p928_p2 = pnand %p926_p1, %p923_p0 }
   0x7   :  { %931 = shalt.err (!%p928_p2)
}
   0x8   :  { %s932_s30 = scalar_lea.vmem %s27_s22, 512  ;;  %p937_p4 = scmp.lt.s32.totalorder %s27_s22, %s27_s22 }
   0x9   :  { %p933_p3 = scmp.ne.s32.totalorder %s27_s22, %s932_s30  ;;  %p938_p5 = scmp.lt.s32.totalorder %s932_s30, %s932_s30 }
   0xb   :  { %p939_p6 = por %p938_p5, %p937_p4 }
   0xd   :  { %p940_p7 = pnand %p939_p6, %p933_p3 }
   0xf   :  { %943 = shalt.err (!%p940_p7)
}
  0x10   :  { %s971_s7 = smov 128   ;;  %s972_s8 = smov 8  }
  0x11   :  { %32 = dma.hbm_to_vmem [thread:$0]  %s1126_s4, 512, %s27_s22, [#allocation3], %s971_s7, %s971_s7, %s972_s8  }
  0x12   :  { %966 = dma.done.wait [#allocation3], 512  }
  0x13   :  { %967 = vsyncadd [#allocation3], 4294966784  ;;  %vm51_vm0 = vcmask 261120   ;;  %v40_v0 = vld [vmem:[%s1124_s2] sm:$0xff]  ;;  %v41_v1 = vld [vmem:[%s1124_s2 + $0x8] sm:$0xff]  ;;  %vm141_vm1 = vcmask 130048  }
  0x14   :  { %v42_v2 = vld [vmem:[%s1124_s2 + $0x10] sm:$0xff]  ;;  %v839_v3 = vpack.c.bf16 %v41_v1, %v40_v0  ;;  %v43_v4 = vld [vmem:[%s1124_s2 + $0x18] sm:$0xff]  ;;  %v38_v5 = vld [vmem:[%s1122_s0] sm:$0xff]  ;;  %s973_s2 = smov 96   ;;  %s974_s26 = smov 64  }
  0x15   :  { %v843_v6 = vpack.c.bf16 %v43_v4, %v42_v2  ;;  %794 = vmatprep.mubr.msk.f32.mxu0 %vm51_vm0, %v38_v5  ;;  %v39_v7 = vld [vmem:[%s1122_s0 + $0x8] sm:$0xff]  ;;  %v736_v8 = vld [vmem:[%s1125_s3] ss:$0 sm:$0xff]  ;;  %vm1058_vm2 = vmpackc.low %vm141_vm1, %vm141_vm1  ;;  %s975_s27 = smov 80   ;;  %s976_s28 = smov 112  }
  0x16   :  { %840 = vmatprep.subr.bf16.mxu0 %v839_v3  ;;  %v1070_v20 = vld [vmem:[%s1123_s1 + $0x8] sm:$0xff]  ;;  %v133_v23 = vld [vmem:[%s1123_s1] sm:$0xff]  ;;  %s977_s1 = smov 48   ;;  %s978_s9 = smov [#allocation5]  }
  0x17   :  { %842 = vmatpush3.bf16.msra.mxu0 %v839_v3  ;;  %s724_s10 = sshll.u32 %s978_s9, 4  ;;  %s725_s10 = int_to_ptr.vmem [resolvable:$true] %s724_s10 }
  0x18   :  { %844 = vmatprep.subr.bf16.mxu0 %v843_v6  ;;  %s944_s11 = scalar_lea.vmem %s725_s10, 256  ;;  %p949_p9 = scmp.lt.s32.totalorder %s725_s10, %s725_s10 }
  0x19   :  { %p945_p8 = scmp.ne.s32.totalorder %s725_s10, %s944_s11  ;;  %p950_p10 = scmp.lt.s32.totalorder %s944_s11, %s944_s11 }
  0x1b   :  { %846 = vmatpush3.bf16.msra.mxu0 %v843_v6  ;;  %p951_p11 = por %p950_p10, %p949_p9 }
  0x1d   :  { %p952_p12 = pnand %p951_p11, %p945_p8 }
  0x1e   :  { %795 = vmatmul.mubr.msk.f32.vlgmr.msra.gmra.mrb[0].mxu0 %vm51_vm0, %v39_v7 }
  0xf1   :  { %v796_v9 = vpop.f32.mrb[0].mxu0 }
  0xf2   :  { %v130_v10 = vadd.f32 %v796_v9, %v736_v8  ;;  %v124_v11 = vpop.f32.mrb[1].mxu0 }
  0xf3   :  { %v125_v12 = vadd.f32 %v736_v8, %v124_v11 }
  0xf5   :  { %801 = vmatprep.mubr.msk.f32.mxu1 %vm141_vm1, %v125_v12  ;;  %v1053_v13 = vpack.i.bf16 %v130_v10, %v125_v12 }
  0xf7   :  { %887 = vrot.lane.b32.xlu0 %v1053_v13, %s973_s2 }
 0x169   :  { %v888_v14 = vpop.permute.xlu0 %887 }
 0x16a   :  { %v890_v15 = vunpack.i.h.bf16 %v888_v14  ;;  %v889_v16 = vunpack.i.l.bf16 %v888_v14 }
 0x16c   :  { %v847_v18 = vpack.c.bf16 %v890_v15, %v889_v16  ;;  %v544_v15 = vld [vmem:[#allocation2 + $0x10] sm:$0xff]  ;;  %v545_v16 = vld [vmem:[#allocation2 + $0x18] sm:$0xff] }
 0x16e   :  { %849 = vmatprep.subr.msk.bf16.mxu1 %vm1058_vm2, %v847_v18 }
 0x16f   :  { %852 = vmatpush3.bf16.xpose.msk.msra.mxu1 %vm1058_vm2, %v847_v18 }
 0x176   :  { %802 = vmatmul.mubr.msk.f32.vlgmr.msra.gmra.mrb[0].mxu1 %vm141_vm1, %v130_v10 }
 0x249   :  { %v803_v19 = vpop.f32.mrb[0].mxu1 }
 0x24a   :  { %v226_v21 = vmul.f32 0.25, %v803_v19  ;;  %v216_v22 = vpop.f32.mrb[1].mxu1 }
 0x24b   :  { %v225_v24 = vmul.f32 0.25, %v216_v22 }
 0x24c   :  { %v228_v25 = vadd.f32 %v226_v21, %v1070_v20 }
 0x24d   :  { %v227_v26 = vadd.f32 %v225_v24, %v133_v23 }
 0x24e   :  { %v232_v27 = vsel %vm141_vm1, %v228_v25, -inf }
 0x24f   :  { %233 = vmax.xlane.f32.xlu1 %v232_v27  ;;  %v229_v28 = vsel %vm141_vm1, %v227_v26, -inf }
 0x250   :  { %230 = vmax.xlane.f32.xlu0 %v229_v28 }
 0x260   :  { %892 = vrot.lane.b32.xlu1 %v1053_v13, %s974_s26 }
 0x264   :  { %897 = vrot.lane.b32.xlu1 %v1053_v13, %s975_s27 }
 0x266   :  { %342 = vrot.lane.b32.xlu0 %v130_v10, %s976_s28 }
 0x2dc   :  { %v234_v29 = vpop.xlane.xlu1 %233 }
 0x2dd   :  { %v236_v30 = vsub.f32 %v228_v25, %v234_v29  ;;  %v231_v31 = vpop.xlane.xlu0 %230  ;;  %v339_v25 = vld [vmem:[#allocation2 + $0x8] sm:$0xff]  ;;  %v755_v29 = vld [vmem:[%s1127_s5] ss:$0 sm:$0xff] }
 0x2de   :  { %v235_v32 = vsub.f32 %v227_v26, %v231_v31 }
 0x2df   :  { %v239_v33 = vmul.f32 1.442695, %v236_v30 }
 0x2e0   :  { %v237_v34 = vmul.f32 1.442695, %v235_v32  ;;  %v893_v35 = vpop.permute.xlu1 %892 }
 0x2e1   :  { %906 = vpow2.f32 %v239_v33  ;;  %v895_v36 = vunpack.i.h.bf16 %v893_v35  ;;  %v894_v37 = vunpack.i.l.bf16 %v893_v35  ;;  %v343_v54 = vpop.permute.xlu0 %342 }
 0x2e2   :  { %908 = vpow2.f32 %v237_v34 }
 0x2e3   :  { %v853_v38 = vpack.c.bf16 %v895_v36, %v894_v37 }
 0x2e4   :  { %v898_v39 = vpop.permute.xlu1 %897 }
 0x2e5   :  { %v900_v40 = vunpack.i.h.bf16 %v898_v39  ;;  %v899_v41 = vunpack.i.l.bf16 %v898_v39  ;;  %854 = vmatprep.subr.bf16.mxu1 %v853_v38 }
 0x2e6   :  { %856 = vmatpush3.bf16.msra.mxu1 %v853_v38 }
 0x2e7   :  { %v857_v42 = vpack.c.bf16 %v900_v40, %v899_v41 }
 0x2e9   :  { %859 = vmatprep.subr.msk.bf16.mxu1 %vm1058_vm2, %v857_v42 }
 0x2eb   :  { %v907_v43 = vpop.eup %906 }
 0x2ec   :  { %v244_v44 = vsel %vm141_vm1, %v907_v43, 0.0  ;;  %v909_v45 = vpop.eup %908 }
 0x2ed   :  { %245 = vadd.xlane.f32.xlu1 %v244_v44  ;;  %v241_v46 = vsel %vm141_vm1, %v909_v45, 0.0 }
 0x2f1   :  { %242 = vadd.xlane.f32.xlu1 %v241_v46 }
 0x302   :  { %340 = vrot.lane.b32.xlu1 %v125_v12, %s976_s28 }
 0x37a   :  { %v246_v47 = vpop.xlane.xlu1 %245 }
 0x37b   :  { %910 = vrcp.f32 %v246_v47 }
 0x37e   :  { %v243_v48 = vpop.xlane.xlu1 %242 }
 0x37f   :  { %912 = vrcp.f32 %v243_v48 }
 0x382   :  { %v341_v53 = vpop.permute.xlu1 %340 }
 0x385   :  { %v911_v49 = vpop.eup %910 }
 0x386   :  { %v250_v52 = vmul.f32 %v911_v49, %v907_v43 }
 0x389   :  { %v913_v50 = vpop.eup %912 }
 0x38a   :  { %v248_v51 = vmul.f32 %v913_v50, %v909_v45 }
 0x38c   :  { %808 = vmatprep.mubr.msk.f32.mxu1 %vm141_vm1, %v248_v51 }
 0x38d   :  { %809 = vmatmul.mubr.msk.f32.vlgmr.msra.gmra.mrb[2].mxu1 %vm141_vm1, %v250_v52 }
 0x38e   :  { %862 = vmatpush3.bf16.xpose.msk.msra.mxu1 %vm1058_vm2, %v857_v42  ;;  %815 = vmatprep.mubr.msk.f32.mxu1 %vm141_vm1, %v341_v53 }
 0x395   :  { %816 = vmatmul.mubr.msk.f32.vlgmr.msra.gmra.mrb[4].mxu1 %vm141_vm1, %v343_v54 }
 0x460   :  { %v810_v55 = vpop.f32.mrb[2].mxu1 }
 0x461   :  { %v329_v56 = vpop.f32.mrb[3].mxu1 }
 0x468   :  { %v817_v57 = vpop.f32.mrb[4].mxu1 }
 0x469   :  { %v432_v58 = vmul.f32 0.25, %v817_v57  ;;  %v422_v59 = vpop.f32.mrb[5].mxu1 }
 0x46a   :  { %v431_v60 = vmul.f32 0.25, %v422_v59 }
 0x46b   :  { %v434_v61 = vadd.f32 %v432_v58, %v1070_v20  ;;  %v867_v20 = vpack.c.bf16 %v545_v16, %v544_v15 }
 0x46c   :  { %v433_v62 = vadd.f32 %v431_v60, %v133_v23 }
 0x46d   :  { %v438_v63 = vsel %vm141_vm1, %v434_v61, -inf }
 0x46e   :  { %439 = vmax.xlane.f32.xlu0 %v438_v63  ;;  %v435_v0 = vsel %vm141_vm1, %v433_v62, -inf }
 0x46f   :  { %436 = vmax.xlane.f32.xlu1 %v435_v0 }
 0x4fb   :  { %v440_v1 = vpop.xlane.xlu0 %439 }
 0x4fc   :  { %v442_v2 = vsub.f32 %v434_v61, %v440_v1  ;;  %v437_v3 = vpop.xlane.xlu1 %436 }
 0x4fd   :  { %v441_v4 = vsub.f32 %v433_v62, %v437_v3 }
 0x4fe   :  { %v445_v5 = vmul.f32 1.442695, %v442_v2 }
 0x4ff   :  { %v443_v6 = vmul.f32 1.442695, %v441_v4 }
 0x500   :  { %914 = vpow2.f32 %v445_v5 }
 0x501   :  { %916 = vpow2.f32 %v443_v6 }
 0x50a   :  { %v915_v7 = vpop.eup %914 }
 0x50b   :  { %v450_v8 = vsel %vm141_vm1, %v915_v7, 0.0  ;;  %v917_v9 = vpop.eup %916 }
 0x50c   :  { %451 = vadd.xlane.f32.xlu1 %v450_v8  ;;  %v447_v10 = vsel %vm141_vm1, %v917_v9, 0.0 }
 0x510   :  { %448 = vadd.xlane.f32.xlu1 %v447_v10 }
 0x521   :  { %902 = vrot.lane.b32.xlu1 %v1053_v13, %s977_s1  ;;  %v338_v13 = vld [vmem:[#allocation2] sm:$0xff] }
 0x522   :  { %v871_v26 = vpack.c.bf16 %v339_v25, %v338_v13 }
 0x599   :  { %v452_v11 = vpop.xlane.xlu1 %451 }
 0x59a   :  { %918 = vrcp.f32 %v452_v11 }
 0x59d   :  { %v449_v12 = vpop.xlane.xlu1 %448 }
 0x59e   :  { %920 = vrcp.f32 %v449_v12 }
 0x5a1   :  { %v903_v14 = vpop.permute.xlu1 %902 }
 0x5a2   :  { %v905_v17 = vunpack.i.h.bf16 %v903_v14  ;;  %v904_v18 = vunpack.i.l.bf16 %v903_v14 }
 0x5a4   :  { %v863_v19 = vpack.c.bf16 %v905_v17, %v904_v18  ;;  %v919_v21 = vpop.eup %918 }
 0x5a5   :  { %v456_v24 = vmul.f32 %v919_v21, %v915_v7 }
 0x5a6   :  { %864 = vmatprep.subr.bf16.mxu0 %v863_v19 }
 0x5a7   :  { %866 = vmatpush3.bf16.msra.mxu0 %v863_v19 }
 0x5a8   :  { %v921_v22 = vpop.eup %920  ;;  %868 = vmatprep.subr.bf16.mxu0 %v867_v20 }
 0x5a9   :  { %v454_v23 = vmul.f32 %v921_v22, %v917_v9 }
 0x5ab   :  { %822 = vmatprep.mubr.msk.f32.mxu0 %vm141_vm1, %v454_v23 }
 0x5ac   :  { %823 = vmatmul.mubr.msk.f32.vlgmr.msra.gmra.mrb[2].mxu0 %vm141_vm1, %v456_v24 }
 0x5ad   :  { %870 = vmatpush3.bf16.msra.mxu0 %v867_v20 }
 0x5ae   :  { %872 = vmatprep.subr.bf16.mxu0 %v871_v26 }
 0x67f   :  { %v824_v27 = vpop.f32.mrb[2].mxu0 }
 0x680   :  { %v535_v28 = vpop.f32.mrb[3].mxu0 }
 0x681   :  { %829 = vmatprep.mubr.msk.f32.mxu0 %vm141_vm1, %v535_v28 }
 0x682   :  { %830 = vmatmul.mubr.msk.f32.vlgmr.msra.gmra.mrb[4].mxu0 %vm141_vm1, %v824_v27 }
 0x683   :  { %874 = vmatpush3.bf16.msra.mxu0 %v871_v26  ;;  %836 = vmatprep.mubr.msk.f32.mxu0 %vm141_vm1, %v329_v56 }
 0x68a   :  { %837 = vmatmul.mubr.msk.f32.vlgmr.msra.gmra.mrb[4].mxu0 %vm141_vm1, %v810_v55 }
 0x75d   :  { %v838_v30 = vpop.f32.mrb[4].mxu0 }
 0x75e   :  { %v716_v31 = vadd.f32 %v838_v30, %v755_v29  ;;  %v699_v32 = vpop.f32.mrb[5].mxu0 }
 0x75f   :  { %v715_v33 = vadd.f32 %v755_v29, %v699_v32 }
 0x760   :  { %718 = vst.msk [vmem:[#allocation5 + $0x8] sm:$0xff] %vm51_vm0, %v716_v31 }
 0x761   :  { %717 = vst.msk [vmem:[#allocation5] sm:$0xff] %vm51_vm0, %v715_v33 }
 0x762   :  { %955 = shalt.err (!%p952_p12)
}
 0x763   :  { %s956_s13 = scalar_lea.hbm %s1128_s6, 256 }
 0x764   :  { %p957_p13 = scmp.ne.s32.totalorder %s1128_s6, %s956_s13  ;;  %p960_p0 = scmp.lt.u32.totalorder %s956_s13, %s1128_s6 }
 0x766   :  { %p962_p1 = pnand %p960_p0, %p957_p13 }
 0x768   :  { %965 = shalt.err (!%p962_p1)
}
 0x769   :  { %730 = dma.vmem_to_hbm [thread:$0]  %s725_s10, 256, %s1128_s6, [#allocation4], %s971_s7, %s971_s7, %s972_s8  }
 0x76a   :  { %968 = dma.done.wait [#allocation4], 256  }
 0x76b   :  { %969 = vsyncadd [#allocation4], 4294967040 }
 0x76c   :  { %734 = vsyncpa [#allocation3], 1 }
 0x76d   :  { %735 = vsyncpa [#allocation4], 1 }

</bundles_post_ra>
